<compile_context>
chip_gen: v6e
topology: v6e:2x2x1
jax: 0.10.0
libtpu: 0.0.40
codegen_flags: <defaults>
</compile_context>

<pallas_src>
import functools

import jax
import jax.numpy as jnp
from jax import lax
from jax.experimental import pallas as pl
from jax.experimental.pallas import tpu as pltpu

_EPS = 1e-5
_LANE = 128
_SUBLANE = 8


def _round_up(x, m):
    return ((x + m - 1) // m) * m


def _pixel_norm(x_f32, n_real):
    # x / sqrt(mean(x**2, axis=-1) + eps), where the mean is over the REAL
    # (un-padded) feature count. Padded lanes are zero so sum == real sum,
    # and 0 * rsqrt(...) keeps them zero.
    ss = jnp.sum(x_f32 * x_f32, axis=-1, keepdims=True)
    return x_f32 * lax.rsqrt(ss * (1.0 / float(n_real)) + _EPS)


def _make_fused_mlp_kernel(feat_dims, normalize_mlp):
    """feat_dims = (d_in, d_out_layer0, ..., d_out_layerL-1): REAL dims."""
    n_layers = len(feat_dims) - 1

    def kernel(x_ref, *refs):
        o_ref = refs[-1]
        wb = refs[:-1]  # (w0, b0, w1, b1, ...)

        h = x_ref[...].astype(jnp.float32)
        if normalize_mlp:
            h = _pixel_norm(h, feat_dims[0])

        for i in range(n_layers):
            w_ref = wb[2 * i]
            b_ref = wb[2 * i + 1]
            # Feed the MXU its native operand dtype; accumulate in f32.
            lhs = h if w_ref.dtype == jnp.float32 else h.astype(w_ref.dtype)
            z = jnp.dot(lhs, w_ref[...], preferred_element_type=jnp.float32)
            z = z + b_ref[...].astype(jnp.float32)
            if i != n_layers - 1:          # ReLU on all but the last layer
                z = jnp.maximum(z, 0.0)
            if normalize_mlp:
                z = _pixel_norm(z, feat_dims[i + 1])
            h = z

        o_ref[...] = h.astype(o_ref.dtype)

    return kernel


@functools.partial(jax.jit, static_argnames=("normalize_mlp", "block_b"))
def mlp_forward(x, params, normalize_mlp=True, block_b=512):
    """x: (B, input_dim); params: list of (w (din,dout), b (1,dout))."""
    B, in_dim = x.shape
    feat_dims = (in_dim,) + tuple(int(w.shape[1]) for (w, _) in params)
    pad_dims = [_round_up(d, _LANE) for d in feat_dims]
    n_layers = len(params)

    # Batch tile: multiple of 8 sublanes, capped at block_b (VMEM-friendly on
    # v7x's 64 MiB; v5e/v6e have plenty of headroom at this size).
    tm = _round_up(min(block_b, _round_up(B, _SUBLANE)), _SUBLANE)
    b_pad = _round_up(B, tm)

    # Zero-pad activations / weights / biases to lane-dense shapes.
    x_p = jnp.zeros((b_pad, pad_dims[0]), x.dtype).at[:B, :in_dim].set(x)
    flat_wb = []
    for i, (w, b) in enumerate(params):
        din, dout = w.shape
        w_p = (jnp.zeros((pad_dims[i], pad_dims[i + 1]), w.dtype)
               .at[:din, :dout].set(w))
        b_p = (jnp.zeros((1, pad_dims[i + 1]), b.dtype)
               .at[:, :dout].set(b.reshape(1, -1)))
        flat_wb += [w_p, b_p]

    kernel = _make_fused_mlp_kernel(feat_dims, normalize_mlp)

    in_specs = [pl.BlockSpec((tm, pad_dims[0]), lambda i: (i, 0))]
    for li in range(n_layers):
        in_specs.append(
            pl.BlockSpec((pad_dims[li], pad_dims[li + 1]), lambda i: (0, 0)))
        in_specs.append(
            pl.BlockSpec((1, pad_dims[li + 1]), lambda i: (0, 0)))

    out_pad = pl.pallas_call(
        kernel,
        out_shape=jax.ShapeDtypeStruct((b_pad, pad_dims[-1]), x.dtype),
        grid=(b_pad // tm,),
        in_specs=in_specs,
        out_specs=pl.BlockSpec((tm, pad_dims[-1]), lambda i: (i, 0)),
        compiler_params=pltpu.CompilerParams(
            dimension_semantics=("parallel",),
            vmem_limit_bytes=32 * 1024 * 1024,  # fits v5e/v6e/v7x scoped VMEM
        ),
    )(x_p, *flat_wb)

    return out_pad[:B, :feat_dims[-1]]


def init_mlp_params(key, input_dim, out_dim, fc_dim, n_fc):
    """Deterministic init matching nn.Linear shapes (stored pre-transposed)."""
    dims_in = [input_dim] + [fc_dim] * (n_fc - 1)
    dims_out = [fc_dim] * (n_fc - 1) + [out_dim]
    params = []
    for din, dout in zip(dims_in, dims_out):
        key, kw, kb = jax.random.split(key, 3)
        bound = 1.0 / jnp.sqrt(din)
        # Stored as (din, dout) == transpose of PyTorch's (dout, din) weight.
        w = jax.random.uniform(kw, (din, dout), jnp.float32, -bound, bound)
        b = jax.random.uniform(kb, (1, dout), jnp.float32, -bound, bound)
        params.append((w, b))
    return params


def mlp_forward_ref(x, params, normalize_mlp=True):
    """Pure-JAX reference of the PyTorch forward."""
    def pn(v):
        return v / jnp.sqrt(jnp.mean(v * v, axis=1, keepdims=True) + _EPS)

    h = pn(x) if normalize_mlp else x
    n = len(params)
    for i, (w, b) in enumerate(params):
        h = jnp.dot(h, w, precision=lax.Precision.HIGHEST) + b
        if i != n - 1:
            h = jnp.maximum(h, 0.0)
        if normalize_mlp:
            h = pn(h)
    return h


if __name__ == "__main__":
    input_dim, out_dim, fc_dim, n_fc = 32, 16, 32, 4
    batch = 8

    key = jax.random.PRNGKey(0)
    kx, kp = jax.random.split(key)
    x = jax.random.normal(kx, (batch, input_dim), jnp.float32)
    params = init_mlp_params(kp, input_dim, out_dim, fc_dim, n_fc)

    out = mlp_forward(x, params, normalize_mlp=True)
    out = jax.block_until_ready(out)

    ref = mlp_forward_ref(x, params, normalize_mlp=True)
    assert out.shape == (batch, out_dim)
    assert jnp.allclose(out, ref, atol=1e-4, rtol=1e-4), (
        float(jnp.max(jnp.abs(out - ref))))

    print("KERNEL_OK")
</pallas_src>

<mosaic_0001>
module attributes {stable_mosaic.version = 11 : i64} {
  func.func @kernel(%arg0: i32, %arg1: memref<8x128xf32, #tpu.memory_space<vmem>>, %arg2: memref<128x128xf32, #tpu.memory_space<vmem>>, %arg3: memref<1x128xf32, #tpu.memory_space<vmem>>, %arg4: memref<128x128xf32, #tpu.memory_space<vmem>>, %arg5: memref<1x128xf32, #tpu.memory_space<vmem>>, %arg6: memref<128x128xf32, #tpu.memory_space<vmem>>, %arg7: memref<1x128xf32, #tpu.memory_space<vmem>>, %arg8: memref<128x128xf32, #tpu.memory_space<vmem>>, %arg9: memref<1x128xf32, #tpu.memory_space<vmem>>, %arg10: memref<8x128xf32, #tpu.memory_space<vmem>>) attributes {dimension_semantics = [#tpu.dimension_semantics<parallel>], iteration_bounds = array<i64: 1>, scalar_prefetch = 0 : i64, scratch_operands = 0 : i64, tpu.core_type = #tpu.core_type<tc>, window_params = [{transform_indices = @transform_0, window_bounds = array<i64: 8, 128>}, {pipeline_mode = #tpu.pipeline_mode<synchronous>, transform_indices = @transform_1, window_bounds = array<i64: 128, 128>}, {pipeline_mode = #tpu.pipeline_mode<synchronous>, transform_indices = @transform_2, window_bounds = array<i64: 1, 128>}, {pipeline_mode = #tpu.pipeline_mode<synchronous>, transform_indices = @transform_3, window_bounds = array<i64: 128, 128>}, {pipeline_mode = #tpu.pipeline_mode<synchronous>, transform_indices = @transform_4, window_bounds = array<i64: 1, 128>}, {pipeline_mode = #tpu.pipeline_mode<synchronous>, transform_indices = @transform_5, window_bounds = array<i64: 128, 128>}, {pipeline_mode = #tpu.pipeline_mode<synchronous>, transform_indices = @transform_6, window_bounds = array<i64: 1, 128>}, {pipeline_mode = #tpu.pipeline_mode<synchronous>, transform_indices = @transform_7, window_bounds = array<i64: 128, 128>}, {pipeline_mode = #tpu.pipeline_mode<synchronous>, transform_indices = @transform_8, window_bounds = array<i64: 1, 128>}, {transform_indices = @transform_9, window_bounds = array<i64: 8, 128>}]} {
    %c0 = arith.constant 0 : index
    %c0_0 = arith.constant 0 : index
    %0 = vector.load %arg1[%c0, %c0_0] : memref<8x128xf32, #tpu.memory_space<vmem>>, vector<8x128xf32>
    %1 = arith.mulf %0, %0 : vector<8x128xf32>
    %cst = arith.constant dense<0.000000e+00> : vector<8xf32>
    %2 = vector.multi_reduction <add>, %1, %cst [1] : vector<8x128xf32> to vector<8xf32>
    %3 = vector.shape_cast %2 : vector<8xf32> to vector<8x1xf32>
    %cst_1 = arith.constant 3.125000e-02 : f32
    %4 = vector.broadcast %cst_1 : f32 to vector<8x1xf32>
    %5 = arith.mulf %3, %4 : vector<8x1xf32>
    %cst_2 = arith.constant 9.99999974E-6 : f32
    %6 = vector.broadcast %cst_2 : f32 to vector<8x1xf32>
    %7 = arith.addf %5, %6 : vector<8x1xf32>
    %8 = math.rsqrt %7 : vector<8x1xf32>
    %9 = vector.broadcast %8 : vector<8x1xf32> to vector<8x128xf32>
    %10 = arith.mulf %0, %9 : vector<8x128xf32>
    %c0_3 = arith.constant 0 : index
    %c0_4 = arith.constant 0 : index
    %11 = vector.load %arg2[%c0_3, %c0_4] : memref<128x128xf32, #tpu.memory_space<vmem>>, vector<128x128xf32>
    %cst_5 = arith.constant dense<0.000000e+00> : vector<8x128xf32>
    %12 = tpu.matmul %10, %11, %cst_5 {dimension_numbers = #tpu.dot_dimension_numbers<[1], [0], [0], [1], [0, 0, 1, 1], [], []>} : vector<8x128xf32>, vector<128x128xf32>, vector<8x128xf32> -> vector<8x128xf32>
    %c0_6 = arith.constant 0 : index
    %c0_7 = arith.constant 0 : index
    %13 = vector.load %arg3[%c0_6, %c0_7] : memref<1x128xf32, #tpu.memory_space<vmem>>, vector<1x128xf32>
    %14 = vector.broadcast %13 : vector<1x128xf32> to vector<8x128xf32>
    %15 = arith.addf %12, %14 : vector<8x128xf32>
    %cst_8 = arith.constant 0.000000e+00 : f32
    %16 = vector.broadcast %cst_8 : f32 to vector<8x128xf32>
    %17 = arith.maximumf %15, %16 : vector<8x128xf32>
    %18 = arith.mulf %17, %17 : vector<8x128xf32>
    %cst_9 = arith.constant dense<0.000000e+00> : vector<8xf32>
    %19 = vector.multi_reduction <add>, %18, %cst_9 [1] : vector<8x128xf32> to vector<8xf32>
    %20 = vector.shape_cast %19 : vector<8xf32> to vector<8x1xf32>
    %cst_10 = arith.constant 3.125000e-02 : f32
    %21 = vector.broadcast %cst_10 : f32 to vector<8x1xf32>
    %22 = arith.mulf %20, %21 : vector<8x1xf32>
    %cst_11 = arith.constant 9.99999974E-6 : f32
    %23 = vector.broadcast %cst_11 : f32 to vector<8x1xf32>
    %24 = arith.addf %22, %23 : vector<8x1xf32>
    %25 = math.rsqrt %24 : vector<8x1xf32>
    %26 = vector.broadcast %25 : vector<8x1xf32> to vector<8x128xf32>
    %27 = arith.mulf %17, %26 : vector<8x128xf32>
    %c0_12 = arith.constant 0 : index
    %c0_13 = arith.constant 0 : index
    %28 = vector.load %arg4[%c0_12, %c0_13] : memref<128x128xf32, #tpu.memory_space<vmem>>, vector<128x128xf32>
    %cst_14 = arith.constant dense<0.000000e+00> : vector<8x128xf32>
    %29 = tpu.matmul %27, %28, %cst_14 {dimension_numbers = #tpu.dot_dimension_numbers<[1], [0], [0], [1], [0, 0, 1, 1], [], []>} : vector<8x128xf32>, vector<128x128xf32>, vector<8x128xf32> -> vector<8x128xf32>
    %c0_15 = arith.constant 0 : index
    %c0_16 = arith.constant 0 : index
    %30 = vector.load %arg5[%c0_15, %c0_16] : memref<1x128xf32, #tpu.memory_space<vmem>>, vector<1x128xf32>
    %31 = vector.broadcast %30 : vector<1x128xf32> to vector<8x128xf32>
    %32 = arith.addf %29, %31 : vector<8x128xf32>
    %cst_17 = arith.constant 0.000000e+00 : f32
    %33 = vector.broadcast %cst_17 : f32 to vector<8x128xf32>
    %34 = arith.maximumf %32, %33 : vector<8x128xf32>
    %35 = arith.mulf %34, %34 : vector<8x128xf32>
    %cst_18 = arith.constant dense<0.000000e+00> : vector<8xf32>
    %36 = vector.multi_reduction <add>, %35, %cst_18 [1] : vector<8x128xf32> to vector<8xf32>
    %37 = vector.shape_cast %36 : vector<8xf32> to vector<8x1xf32>
    %cst_19 = arith.constant 3.125000e-02 : f32
    %38 = vector.broadcast %cst_19 : f32 to vector<8x1xf32>
    %39 = arith.mulf %37, %38 : vector<8x1xf32>
    %cst_20 = arith.constant 9.99999974E-6 : f32
    %40 = vector.broadcast %cst_20 : f32 to vector<8x1xf32>
    %41 = arith.addf %39, %40 : vector<8x1xf32>
    %42 = math.rsqrt %41 : vector<8x1xf32>
    %43 = vector.broadcast %42 : vector<8x1xf32> to vector<8x128xf32>
    %44 = arith.mulf %34, %43 : vector<8x128xf32>
    %c0_21 = arith.constant 0 : index
    %c0_22 = arith.constant 0 : index
    %45 = vector.load %arg6[%c0_21, %c0_22] : memref<128x128xf32, #tpu.memory_space<vmem>>, vector<128x128xf32>
    %cst_23 = arith.constant dense<0.000000e+00> : vector<8x128xf32>
    %46 = tpu.matmul %44, %45, %cst_23 {dimension_numbers = #tpu.dot_dimension_numbers<[1], [0], [0], [1], [0, 0, 1, 1], [], []>} : vector<8x128xf32>, vector<128x128xf32>, vector<8x128xf32> -> vector<8x128xf32>
    %c0_24 = arith.constant 0 : index
    %c0_25 = arith.constant 0 : index
    %47 = vector.load %arg7[%c0_24, %c0_25] : memref<1x128xf32, #tpu.memory_space<vmem>>, vector<1x128xf32>
    %48 = vector.broadcast %47 : vector<1x128xf32> to vector<8x128xf32>
    %49 = arith.addf %46, %48 : vector<8x128xf32>
    %cst_26 = arith.constant 0.000000e+00 : f32
    %50 = vector.broadcast %cst_26 : f32 to vector<8x128xf32>
    %51 = arith.maximumf %49, %50 : vector<8x128xf32>
    %52 = arith.mulf %51, %51 : vector<8x128xf32>
    %cst_27 = arith.constant dense<0.000000e+00> : vector<8xf32>
    %53 = vector.multi_reduction <add>, %52, %cst_27 [1] : vector<8x128xf32> to vector<8xf32>
    %54 = vector.shape_cast %53 : vector<8xf32> to vector<8x1xf32>
    %cst_28 = arith.constant 3.125000e-02 : f32
    %55 = vector.broadcast %cst_28 : f32 to vector<8x1xf32>
    %56 = arith.mulf %54, %55 : vector<8x1xf32>
    %cst_29 = arith.constant 9.99999974E-6 : f32
    %57 = vector.broadcast %cst_29 : f32 to vector<8x1xf32>
    %58 = arith.addf %56, %57 : vector<8x1xf32>
    %59 = math.rsqrt %58 : vector<8x1xf32>
    %60 = vector.broadcast %59 : vector<8x1xf32> to vector<8x128xf32>
    %61 = arith.mulf %51, %60 : vector<8x128xf32>
    %c0_30 = arith.constant 0 : index
    %c0_31 = arith.constant 0 : index
    %62 = vector.load %arg8[%c0_30, %c0_31] : memref<128x128xf32, #tpu.memory_space<vmem>>, vector<128x128xf32>
    %cst_32 = arith.constant dense<0.000000e+00> : vector<8x128xf32>
    %63 = tpu.matmul %61, %62, %cst_32 {dimension_numbers = #tpu.dot_dimension_numbers<[1], [0], [0], [1], [0, 0, 1, 1], [], []>} : vector<8x128xf32>, vector<128x128xf32>, vector<8x128xf32> -> vector<8x128xf32>
    %c0_33 = arith.constant 0 : index
    %c0_34 = arith.constant 0 : index
    %64 = vector.load %arg9[%c0_33, %c0_34] : memref<1x128xf32, #tpu.memory_space<vmem>>, vector<1x128xf32>
    %65 = vector.broadcast %64 : vector<1x128xf32> to vector<8x128xf32>
    %66 = arith.addf %63, %65 : vector<8x128xf32>
    %67 = arith.mulf %66, %66 : vector<8x128xf32>
    %cst_35 = arith.constant dense<0.000000e+00> : vector<8xf32>
    %68 = vector.multi_reduction <add>, %67, %cst_35 [1] : vector<8x128xf32> to vector<8xf32>
    %69 = vector.shape_cast %68 : vector<8xf32> to vector<8x1xf32>
    %cst_36 = arith.constant 6.250000e-02 : f32
    %70 = vector.broadcast %cst_36 : f32 to vector<8x1xf32>
    %71 = arith.mulf %69, %70 : vector<8x1xf32>
    %cst_37 = arith.constant 9.99999974E-6 : f32
    %72 = vector.broadcast %cst_37 : f32 to vector<8x1xf32>
    %73 = arith.addf %71, %72 : vector<8x1xf32>
    %74 = math.rsqrt %73 : vector<8x1xf32>
    %75 = vector.broadcast %74 : vector<8x1xf32> to vector<8x128xf32>
    %76 = arith.mulf %66, %75 : vector<8x128xf32>
    %c0_38 = arith.constant 0 : index
    %c0_39 = arith.constant 0 : index
    %77 = vector.load %arg10[%c0_38, %c0_39] : memref<8x128xf32, #tpu.memory_space<vmem>>, vector<8x128xf32>
    tpu.vector_store %arg10[%c0_38, %c0_39], %76 {strides = array<i32>} : memref<8x128xf32, #tpu.memory_space<vmem>>, vector<8x128xf32>,
    return
  }
  func.func @transform_0(%arg0: i32) -> (i32, i32) {
    %c0_i32 = arith.constant 0 : i32
    %c0_i32_0 = arith.constant 0 : i32
    return %arg0, %c0_i32 : i32, i32
  }
  func.func @transform_1(%arg0: i32) -> (i32, i32) {
    %c0_i32 = arith.constant 0 : i32
    %c0_i32_0 = arith.constant 0 : i32
    %c0_i32_1 = arith.constant 0 : i32
    return %c0_i32, %c0_i32_0 : i32, i32
  }
  func.func @transform_2(%arg0: i32) -> (i32, i32) {
    %c0_i32 = arith.constant 0 : i32
    %c0_i32_0 = arith.constant 0 : i32
    %c0_i32_1 = arith.constant 0 : i32
    return %c0_i32, %c0_i32_0 : i32, i32
  }
  func.func @transform_3(%arg0: i32) -> (i32, i32) {
    %c0_i32 = arith.constant 0 : i32
    %c0_i32_0 = arith.constant 0 : i32
    %c0_i32_1 = arith.constant 0 : i32
    return %c0_i32, %c0_i32_0 : i32, i32
  }
  func.func @transform_4(%arg0: i32) -> (i32, i32) {
    %c0_i32 = arith.constant 0 : i32
    %c0_i32_0 = arith.constant 0 : i32
    %c0_i32_1 = arith.constant 0 : i32
    return %c0_i32, %c0_i32_0 : i32, i32
  }
  func.func @transform_5(%arg0: i32) -> (i32, i32) {
    %c0_i32 = arith.constant 0 : i32
    %c0_i32_0 = arith.constant 0 : i32
    %c0_i32_1 = arith.constant 0 : i32
    return %c0_i32, %c0_i32_0 : i32, i32
  }
  func.func @transform_6(%arg0: i32) -> (i32, i32) {
    %c0_i32 = arith.constant 0 : i32
    %c0_i32_0 = arith.constant 0 : i32
    %c0_i32_1 = arith.constant 0 : i32
    return %c0_i32, %c0_i32_0 : i32, i32
  }
  func.func @transform_7(%arg0: i32) -> (i32, i32) {
    %c0_i32 = arith.constant 0 : i32
    %c0_i32_0 = arith.constant 0 : i32
    %c0_i32_1 = arith.constant 0 : i32
    return %c0_i32, %c0_i32_0 : i32, i32
  }
  func.func @transform_8(%arg0: i32) -> (i32, i32) {
    %c0_i32 = arith.constant 0 : i32
    %c0_i32_0 = arith.constant 0 : i32
    %c0_i32_1 = arith.constant 0 : i32
    return %c0_i32, %c0_i32_0 : i32, i32
  }
  func.func @transform_9(%arg0: i32) -> (i32, i32) {
    %c0_i32 = arith.constant 0 : i32
    %c0_i32_0 = arith.constant 0 : i32
    return %arg0, %c0_i32 : i32, i32
  }
}

</mosaic_0001>

<bundles_post_ra>
// kernel: mlp_forward.1
= control target key start
LH: loop header
LB: loop body
LE: loop exit
PB: predicated region body
PF: predicated region fallthrough
CT: control target
= control target key end

     0   :  { %v706_v3 = vmov 0.0   ;;  %s1046_s0 = inlined_call_operand.vmem [shape: f32[8,128], index: 0, kind: input, shape index: {}]   ;;  %s1047_s1 = inlined_call_operand.vmem [shape: f32[128,128], index: 1, kind: input, shape index: {}]   ;;  %s1048_s2 = inlined_call_operand.vmem [shape: f32[1,128], index: 2, kind: input, shape index: {}]   ;;  %s1049_s3 = inlined_call_operand.vmem [shape: f32[128,128], index: 3, kind: input, shape index: {}]   ;;  %s1050_s4 = inlined_call_operand.vmem [shape: f32[1,128], index: 4, kind: input, shape index: {}]   ;;  %s1051_s5 = inlined_call_operand.vmem [shape: f32[128,128], index: 5, kind: input, shape index: {}]   ;;  %s1052_s6 = inlined_call_operand.vmem [shape: f32[1,128], index: 6, kind: input, shape index: {}]   ;;  %s1053_s7 = inlined_call_operand.vmem [shape: f32[128,128], index: 7, kind: input, shape index: {}]   ;;  %s1054_s8 = inlined_call_operand.vmem [shape: f32[1,128], index: 8, kind: input, shape index: {}]   ;;  %s1055_s9 = inlined_call_operand.hbm [shape: f32[8,128], index: 9, kind: output, shape index: {}]  }
   0x1   :  { %v762_v0 = vld [vmem:[%s1046_s0] sm:$0xff]  ;;  %v56_v1 = vld [vmem:[%s1047_s1 + $0x78] sm:$0xff]  ;;  %531 = vmatprep.subr.mxu0 %v706_v3  ;;  %v55_v4 = vld [vmem:[%s1047_s1 + $0x70] sm:$0xff]  ;;  %566 = vmatprep.subr.mxu1 %v706_v3 }
   0x2   :  { %v34_v2 = vmul.f32 %v762_v0, %v762_v0  ;;  %532 = vmatpush3.msra.mxu0 %v56_v1 }
   0x3   :  { %14 = vsyncpa [#allocation3], 0  ;;  %533 = vmatprep.subr.mxu0 %v706_v3  ;;  %v54_v5 = vld [vmem:[%s1047_s1 + $0x68] sm:$0xff]  ;;  %v53_v6 = vld [vmem:[%s1047_s1 + $0x60] sm:$0xff]  ;;  %vm707_vm0 = vmmov 0  }
   0x4   :  { %35 = vadd.xlane.f32.xlu0 %v34_v2  ;;  %534 = vmatpush3.msra.mxu0 %v55_v4  ;;  %v52_v7 = vld [vmem:[%s1047_s1 + $0x58] sm:$0xff]  ;;  %v51_v8 = vld [vmem:[%s1047_s1 + $0x50] sm:$0xff]  ;;  %v50_v9 = vld [vmem:[%s1047_s1 + $0x48] sm:$0xff] }
   0x5   :  { %535 = vmatprep.subr.mxu0 %v706_v3  ;;  %v49_v10 = vld [vmem:[%s1047_s1 + $0x40] sm:$0xff]  ;;  %v48_v11 = vld [vmem:[%s1047_s1 + $0x38] sm:$0xff]  ;;  %v47_v12 = vld [vmem:[%s1047_s1 + $0x30] sm:$0xff]  ;;  %563 = vmatprep.mubr.msk.f32.mxu0 %vm707_vm0, %v706_v3 }
   0x6   :  { %536 = vmatpush3.msra.mxu0 %v54_v5  ;;  %v46_v13 = vld [vmem:[%s1047_s1 + $0x28] sm:$0xff]  ;;  %598 = vmatprep.mubr.msk.f32.mxu1 %vm707_vm0, %v706_v3  ;;  %v45_v14 = vld [vmem:[%s1047_s1 + $0x20] sm:$0xff]  ;;  %v44_v15 = vld [vmem:[%s1047_s1 + $0x18] sm:$0xff] }
   0x7   :  { %537 = vmatprep.subr.mxu0 %v706_v3  ;;  %v43_v16 = vld [vmem:[%s1047_s1 + $0x10] sm:$0xff]  ;;  %v42_v17 = vld [vmem:[%s1047_s1 + $0x8] sm:$0xff]  ;;  %v41_v18 = vld [vmem:[%s1047_s1] sm:$0xff] }
   0x8   :  { %538 = vmatpush3.msra.mxu0 %v53_v6  ;;  %v157_v24 = vld [vmem:[%s1049_s3 + $0x78] sm:$0xff]  ;;  %v156_v25 = vld [vmem:[%s1049_s3 + $0x70] sm:$0xff]  ;;  %v155_v26 = vld [vmem:[%s1049_s3 + $0x68] sm:$0xff] }
   0x9   :  { %539 = vmatprep.subr.mxu0 %v706_v3  ;;  %567 = vmatpush3.msra.mxu1 %v157_v24  ;;  %v154_v27 = vld [vmem:[%s1049_s3 + $0x60] sm:$0xff]  ;;  %v153_v28 = vld [vmem:[%s1049_s3 + $0x58] sm:$0xff]  ;;  %v152_v29 = vld [vmem:[%s1049_s3 + $0x50] sm:$0xff] }
   0xa   :  { %540 = vmatpush3.msra.mxu0 %v52_v7  ;;  %568 = vmatprep.subr.mxu1 %v706_v3  ;;  %v459_v30 = vld [vmem:[%s1048_s2] ss:$0 sm:$0xff]  ;;  %v151_v36 = vld [vmem:[%s1049_s3 + $0x48] sm:$0xff]  ;;  %v149_v38 = vld [vmem:[%s1049_s3 + $0x38] sm:$0xff] }
   0xb   :  { %541 = vmatprep.subr.mxu0 %v706_v3  ;;  %569 = vmatpush3.msra.mxu1 %v156_v25  ;;  %v150_v37 = vld [vmem:[%s1049_s3 + $0x40] sm:$0xff]  ;;  %v148_v39 = vld [vmem:[%s1049_s3 + $0x30] sm:$0xff]  ;;  %v147_v40 = vld [vmem:[%s1049_s3 + $0x28] sm:$0xff] }
   0xc   :  { %542 = vmatpush3.msra.mxu0 %v51_v8  ;;  %570 = vmatprep.subr.mxu1 %v706_v3  ;;  %v146_v41 = vld [vmem:[%s1049_s3 + $0x20] sm:$0xff]  ;;  %v145_v42 = vld [vmem:[%s1049_s3 + $0x18] sm:$0xff]  ;;  %v144_v43 = vld [vmem:[%s1049_s3 + $0x10] sm:$0xff] }
   0xd   :  { %543 = vmatprep.subr.mxu0 %v706_v3  ;;  %571 = vmatpush3.msra.mxu1 %v155_v26  ;;  %v143_v44 = vld [vmem:[%s1049_s3 + $0x8] sm:$0xff]  ;;  %v142_v45 = vld [vmem:[%s1049_s3] sm:$0xff]  ;;  %v258_v51 = vld [vmem:[%s1051_s5 + $0x78] sm:$0xff] }
   0xe   :  { %544 = vmatpush3.msra.mxu0 %v50_v9  ;;  %572 = vmatprep.subr.mxu1 %v706_v3  ;;  %v257_v52 = vld [vmem:[%s1051_s5 + $0x70] sm:$0xff]  ;;  %v256_v53 = vld [vmem:[%s1051_s5 + $0x68] sm:$0xff]  ;;  %v255_v54 = vld [vmem:[%s1051_s5 + $0x60] sm:$0xff] }
   0xf   :  { %545 = vmatprep.subr.mxu0 %v706_v3  ;;  %573 = vmatpush3.msra.mxu1 %v154_v27  ;;  %v254_v55 = vld [vmem:[%s1051_s5 + $0x58] sm:$0xff]  ;;  %v253_v56 = vld [vmem:[%s1051_s5 + $0x50] sm:$0xff]  ;;  %v460_v57 = vld [vmem:[%s1050_s4] ss:$0 sm:$0xff] }
  0x10   :  { %546 = vmatpush3.msra.mxu0 %v49_v10  ;;  %574 = vmatprep.subr.mxu1 %v706_v3  ;;  %v252_v63 = vld [vmem:[%s1051_s5 + $0x48] sm:$0xff]  ;;  %v250_v1 = vld [vmem:[%s1051_s5 + $0x38] sm:$0xff]  ;;  %v249_v2 = vld [vmem:[%s1051_s5 + $0x30] sm:$0xff] }
  0x11   :  { %547 = vmatprep.subr.mxu0 %v706_v3  ;;  %575 = vmatpush3.msra.mxu1 %v153_v28  ;;  %v248_v4 = vld [vmem:[%s1051_s5 + $0x28] sm:$0xff]  ;;  %v247_v5 = vld [vmem:[%s1051_s5 + $0x20] sm:$0xff]  ;;  %v246_v6 = vld [vmem:[%s1051_s5 + $0x18] sm:$0xff] }
  0x12   :  { %548 = vmatpush3.msra.mxu0 %v48_v11  ;;  %576 = vmatprep.subr.mxu1 %v706_v3  ;;  %v245_v7 = vld [vmem:[%s1051_s5 + $0x10] sm:$0xff]  ;;  %v244_v8 = vld [vmem:[%s1051_s5 + $0x8] sm:$0xff]  ;;  %v243_v9 = vld [vmem:[%s1051_s5] sm:$0xff] }
  0x13   :  { %549 = vmatprep.subr.mxu0 %v706_v3  ;;  %577 = vmatpush3.msra.mxu1 %v152_v29  ;;  %v353_v27 = vld [vmem:[%s1053_s7 + $0x48] sm:$0xff]  ;;  %v352_v28 = vld [vmem:[%s1053_s7 + $0x40] sm:$0xff]  ;;  %v351_v29 = vld [vmem:[%s1053_s7 + $0x38] sm:$0xff] }
  0x14   :  { %550 = vmatpush3.msra.mxu0 %v47_v12  ;;  %578 = vmatprep.subr.mxu1 %v706_v3 }
  0x15   :  { %551 = vmatprep.subr.mxu0 %v706_v3  ;;  %579 = vmatpush3.msra.mxu1 %v151_v36  ;;  %v344_v36 = vld [vmem:[%s1053_s7] sm:$0xff] }
  0x16   :  { %552 = vmatpush3.msra.mxu0 %v46_v13  ;;  %580 = vmatprep.subr.mxu1 %v706_v3 }
  0x17   :  { %553 = vmatprep.subr.mxu0 %v706_v3  ;;  %581 = vmatpush3.msra.mxu1 %v150_v37 }
  0x18   :  { %554 = vmatpush3.msra.mxu0 %v45_v14  ;;  %582 = vmatprep.subr.mxu1 %v706_v3 }
  0x19   :  { %555 = vmatprep.subr.mxu0 %v706_v3  ;;  %583 = vmatpush3.msra.mxu1 %v149_v38 }
  0x1a   :  { %556 = vmatpush3.msra.mxu0 %v44_v15  ;;  %584 = vmatprep.subr.mxu1 %v706_v3  ;;  %v359_v15 = vld [vmem:[%s1053_s7 + $0x78] sm:$0xff] }
  0x1b   :  { %557 = vmatprep.subr.mxu0 %v706_v3  ;;  %585 = vmatpush3.msra.mxu1 %v148_v39 }
  0x1c   :  { %558 = vmatpush3.msra.mxu0 %v43_v16  ;;  %586 = vmatprep.subr.mxu1 %v706_v3  ;;  %v358_v16 = vld [vmem:[%s1053_s7 + $0x70] sm:$0xff] }
  0x1d   :  { %559 = vmatprep.subr.mxu0 %v706_v3  ;;  %587 = vmatpush3.msra.mxu1 %v147_v40 }
  0x1e   :  { %560 = vmatpush3.msra.mxu0 %v42_v17  ;;  %588 = vmatprep.subr.mxu1 %v706_v3  ;;  %v357_v17 = vld [vmem:[%s1053_s7 + $0x68] sm:$0xff] }
  0x1f   :  { %561 = vmatprep.subr.mxu0 %v706_v3  ;;  %589 = vmatpush3.msra.mxu1 %v146_v41 }
  0x20   :  { %562 = vmatpush3.msra.mxu0 %v41_v18  ;;  %590 = vmatprep.subr.mxu1 %v706_v3  ;;  %v356_v18 = vld [vmem:[%s1053_s7 + $0x60] sm:$0xff] }
  0x21   :  { %601 = vmatprep.subr.mxu0 %v706_v3  ;;  %591 = vmatpush3.msra.mxu1 %v145_v42  ;;  %v462_v42 = vld [vmem:[%s1054_s8] ss:$0 sm:$0xff] }
  0x22   :  { %592 = vmatprep.subr.mxu1 %v706_v3 }
  0x23   :  { %593 = vmatpush3.msra.mxu1 %v144_v43 }
  0x24   :  { %594 = vmatprep.subr.mxu1 %v706_v3 }
  0x25   :  { %595 = vmatpush3.msra.mxu1 %v143_v44 }
  0x26   :  { %596 = vmatprep.subr.mxu1 %v706_v3 }
  0x27   :  { %597 = vmatpush3.msra.mxu1 %v142_v45 }
  0x28   :  { %636 = vmatprep.subr.mxu1 %v706_v3 }
  0x8d   :  { %v36_v19 = vpop.xlane.xlu0 %35 }
  0x8e   :  { %v37_v20 = vmul.f32 0.03125, %v36_v19  ;;  %v355_v19 = vld [vmem:[%s1053_s7 + $0x58] sm:$0xff] }
  0x90   :  { %v38_v21 = vadd.f32 1e-05, %v37_v20  ;;  %v354_v20 = vld [vmem:[%s1053_s7 + $0x50] sm:$0xff] }
  0x92   :  { %674 = vrsqrt.f32 %v38_v21  ;;  %v461_v21 = vld [vmem:[%s1052_s6] ss:$0 sm:$0xff] }
  0x9f   :  { %v675_v22 = vpop.eup %674 }
  0xa0   :  { %v40_v23 = vmul.f32 %v675_v22, %v762_v0  ;;  %v251_v0 = vld [vmem:[%s1051_s5 + $0x40] sm:$0xff] }
  0xa2   :  { %564 = vmatmul.mubr.f32.vlgmr.msra.gmra.mxu0 %v40_v23 }
  0xa3   :  { %633 = vmatprep.mubr.msk.f32.mxu0 %vm707_vm0, %v706_v3  ;;  %602 = vmatpush3.msra.mxu0 %v258_v51 }
  0xa4   :  { %603 = vmatprep.subr.mxu0 %v706_v3 }
  0xa5   :  { %604 = vmatpush3.msra.mxu0 %v257_v52 }
  0xa6   :  { %605 = vmatprep.subr.mxu0 %v706_v3 }
  0xa7   :  { %606 = vmatpush3.msra.mxu0 %v256_v53 }
  0xa8   :  { %607 = vmatprep.subr.mxu0 %v706_v3 }
  0xa9   :  { %608 = vmatpush3.msra.mxu0 %v255_v54 }
  0xaa   :  { %609 = vmatprep.subr.mxu0 %v706_v3 }
  0xab   :  { %610 = vmatpush3.msra.mxu0 %v254_v55 }
  0xac   :  { %611 = vmatprep.subr.mxu0 %v706_v3 }
  0xad   :  { %612 = vmatpush3.msra.mxu0 %v253_v56 }
  0xae   :  { %613 = vmatprep.subr.mxu0 %v706_v3 }
  0xaf   :  { %614 = vmatpush3.msra.mxu0 %v252_v63 }
  0xb0   :  { %615 = vmatprep.subr.mxu0 %v706_v3 }
  0xb1   :  { %616 = vmatpush3.msra.mxu0 %v251_v0 }
  0xb2   :  { %617 = vmatprep.subr.mxu0 %v706_v3 }
  0xb3   :  { %618 = vmatpush3.msra.mxu0 %v250_v1 }
  0xb4   :  { %619 = vmatprep.subr.mxu0 %v706_v3 }
  0xb5   :  { %620 = vmatpush3.msra.mxu0 %v249_v2 }
  0xb6   :  { %621 = vmatprep.subr.mxu0 %v706_v3 }
  0xb7   :  { %622 = vmatpush3.msra.mxu0 %v248_v4 }
  0xb8   :  { %623 = vmatprep.subr.mxu0 %v706_v3 }
  0xb9   :  { %624 = vmatpush3.msra.mxu0 %v247_v5 }
  0xba   :  { %625 = vmatprep.subr.mxu0 %v706_v3 }
  0xbb   :  { %626 = vmatpush3.msra.mxu0 %v246_v6 }
  0xbc   :  { %627 = vmatprep.subr.mxu0 %v706_v3 }
  0xbd   :  { %628 = vmatpush3.msra.mxu0 %v245_v7 }
  0xbe   :  { %629 = vmatprep.subr.mxu0 %v706_v3 }
  0xbf   :  { %630 = vmatpush3.msra.mxu0 %v244_v8 }
  0xc0   :  { %631 = vmatprep.subr.mxu0 %v706_v3 }
  0xc1   :  { %632 = vmatpush3.msra.mxu0 %v243_v9 }
 0x162   :  { %v130_v31 = vpop.f32.mrf.mxu0 }
 0x163   :  { %v131_v32 = vadd.f32 %v459_v30, %v130_v31  ;;  %v350_v30 = vld [vmem:[%s1053_s7 + $0x30] sm:$0xff]  ;;  %v349_v31 = vld [vmem:[%s1053_s7 + $0x28] sm:$0xff] }
 0x164   :  { %v565_v33 = vpop.f32.mrf.mxu0 }
 0x165   :  { %v134_v34 = vmax.f32 %v131_v32, 0.0  ;;  %v348_v32 = vld [vmem:[%s1053_s7 + $0x20] sm:$0xff]  ;;  %v347_v33 = vld [vmem:[%s1053_s7 + $0x18] sm:$0xff] }
 0x167   :  { %v135_v35 = vmul.f32 %v134_v34, %v134_v34 }
 0x169   :  { %136 = vadd.xlane.f32.xlu0 %v135_v35  ;;  %v345_v35 = vld [vmem:[%s1053_s7 + $0x8] sm:$0xff] }
 0x1f2   :  { %v137_v46 = vpop.xlane.xlu0 %136 }
 0x1f3   :  { %v138_v47 = vmul.f32 0.03125, %v137_v46 }
 0x1f5   :  { %v139_v48 = vadd.f32 1e-05, %v138_v47 }
 0x1f7   :  { %676 = vrsqrt.f32 %v139_v48 }
 0x204   :  { %v677_v49 = vpop.eup %676 }
 0x205   :  { %v141_v50 = vmul.f32 %v677_v49, %v134_v34  ;;  %v346_v34 = vld [vmem:[%s1053_s7 + $0x10] sm:$0xff]  ;;  %s708_s7 = smov [#allocation2]  }
 0x206   :  { %s451_s20 = sshll.u32 %s708_s7, 4  ;;  %s452_s20 = int_to_ptr.vmem [resolvable:$true] %s451_s20 }
 0x207   :  { %599 = vmatmul.mubr.f32.vlgmr.msra.gmra.mxu1 %v141_v50  ;;  %s684_s21 = scalar_lea.vmem %s452_s20, 128  ;;  %p689_p1 = scmp.lt.s32.totalorder %s452_s20, %s452_s20 }
 0x208   :  { %668 = vmatprep.mubr.msk.f32.mxu1 %vm707_vm0, %v706_v3  ;;  %637 = vmatpush3.msra.mxu1 %v359_v15  ;;  %p685_p0 = scmp.ne.s32.totalorder %s452_s20, %s684_s21  ;;  %p690_p2 = scmp.lt.s32.totalorder %s684_s21, %s684_s21 }
 0x209   :  { %638 = vmatprep.subr.mxu1 %v706_v3 }
 0x20a   :  { %639 = vmatpush3.msra.mxu1 %v358_v16  ;;  %p691_p3 = por %p690_p2, %p689_p1 }
 0x20b   :  { %640 = vmatprep.subr.mxu1 %v706_v3 }
 0x20c   :  { %641 = vmatpush3.msra.mxu1 %v357_v17  ;;  %p692_p4 = pnand %p691_p3, %p685_p0 }
 0x20d   :  { %642 = vmatprep.subr.mxu1 %v706_v3 }
 0x20e   :  { %643 = vmatpush3.msra.mxu1 %v356_v18 }
 0x20f   :  { %644 = vmatprep.subr.mxu1 %v706_v3 }
 0x210   :  { %645 = vmatpush3.msra.mxu1 %v355_v19 }
 0x211   :  { %646 = vmatprep.subr.mxu1 %v706_v3 }
 0x212   :  { %647 = vmatpush3.msra.mxu1 %v354_v20 }
 0x213   :  { %648 = vmatprep.subr.mxu1 %v706_v3 }
 0x214   :  { %649 = vmatpush3.msra.mxu1 %v353_v27 }
 0x215   :  { %650 = vmatprep.subr.mxu1 %v706_v3 }
 0x216   :  { %651 = vmatpush3.msra.mxu1 %v352_v28 }
 0x217   :  { %652 = vmatprep.subr.mxu1 %v706_v3 }
 0x218   :  { %653 = vmatpush3.msra.mxu1 %v351_v29 }
 0x219   :  { %654 = vmatprep.subr.mxu1 %v706_v3 }
 0x21a   :  { %655 = vmatpush3.msra.mxu1 %v350_v30 }
 0x21b   :  { %656 = vmatprep.subr.mxu1 %v706_v3 }
 0x21c   :  { %657 = vmatpush3.msra.mxu1 %v349_v31 }
 0x21d   :  { %658 = vmatprep.subr.mxu1 %v706_v3 }
 0x21e   :  { %659 = vmatpush3.msra.mxu1 %v348_v32 }
 0x21f   :  { %660 = vmatprep.subr.mxu1 %v706_v3 }
 0x220   :  { %661 = vmatpush3.msra.mxu1 %v347_v33 }
 0x221   :  { %662 = vmatprep.subr.mxu1 %v706_v3 }
 0x222   :  { %663 = vmatpush3.msra.mxu1 %v346_v34 }
 0x223   :  { %664 = vmatprep.subr.mxu1 %v706_v3 }
 0x224   :  { %665 = vmatpush3.msra.mxu1 %v345_v35 }
 0x225   :  { %666 = vmatprep.subr.mxu1 %v706_v3 }
 0x226   :  { %667 = vmatpush3.msra.mxu1 %v344_v36 }
 0x2c7   :  { %v231_v58 = vpop.f32.mrf.mxu1 }
 0x2c8   :  { %v232_v59 = vadd.f32 %v460_v57, %v231_v58 }
 0x2c9   :  { %v600_v60 = vpop.f32.mrf.mxu1 }
 0x2ca   :  { %v235_v61 = vmax.f32 %v232_v59, 0.0 }
 0x2cc   :  { %v236_v62 = vmul.f32 %v235_v61, %v235_v61 }
 0x2ce   :  { %237 = vadd.xlane.f32.xlu1 %v236_v62 }
 0x357   :  { %v238_v10 = vpop.xlane.xlu1 %237 }
 0x358   :  { %v239_v11 = vmul.f32 0.03125, %v238_v10 }
 0x35a   :  { %v240_v12 = vadd.f32 1e-05, %v239_v11 }
 0x35c   :  { %678 = vrsqrt.f32 %v240_v12 }
 0x369   :  { %v679_v13 = vpop.eup %678 }
 0x36a   :  { %v242_v14 = vmul.f32 %v679_v13, %v235_v61 }
 0x36c   :  { %634 = vmatmul.mubr.f32.vlgmr.msra.gmra.mxu0 %v242_v14 }
 0x42c   :  { %v332_v22 = vpop.f32.mrf.mxu0 }
 0x42d   :  { %v333_v23 = vadd.f32 %v461_v21, %v332_v22 }
 0x42e   :  { %v635_v24 = vpop.f32.mrf.mxu0 }
 0x42f   :  { %v336_v25 = vmax.f32 %v333_v23, 0.0 }
 0x431   :  { %v337_v26 = vmul.f32 %v336_v25, %v336_v25 }
 0x433   :  { %338 = vadd.xlane.f32.xlu1 %v337_v26 }
 0x4bc   :  { %v339_v37 = vpop.xlane.xlu1 %338 }
 0x4bd   :  { %v340_v38 = vmul.f32 0.03125, %v339_v37 }
 0x4bf   :  { %v341_v39 = vadd.f32 1e-05, %v340_v38 }
 0x4c1   :  { %680 = vrsqrt.f32 %v341_v39 }
 0x4ce   :  { %v681_v40 = vpop.eup %680 }
 0x4cf   :  { %v343_v41 = vmul.f32 %v681_v40, %v336_v25 }
 0x4d1   :  { %669 = vmatmul.mubr.f32.vlgmr.msra.gmra.mxu1 %v343_v41 }
 0x591   :  { %v433_v43 = vpop.f32.mrf.mxu1 }
 0x592   :  { %v434_v44 = vadd.f32 %v462_v42, %v433_v43 }
 0x593   :  { %v670_v45 = vpop.f32.mrf.mxu1 }
 0x594   :  { %v437_v46 = vmul.f32 %v434_v44, %v434_v44 }
 0x596   :  { %438 = vadd.xlane.f32.xlu0 %v437_v46 }
 0x61f   :  { %v439_v47 = vpop.xlane.xlu0 %438 }
 0x620   :  { %v440_v48 = vmul.f32 0.0625, %v439_v47 }
 0x622   :  { %v441_v3 = vadd.f32 1e-05, %v440_v48 }
 0x624   :  { %682 = vrsqrt.f32 %v441_v3 }
 0x631   :  { %v683_v49 = vpop.eup %682 }
 0x632   :  { %v443_v50 = vmul.f32 %v683_v49, %v434_v44 }
 0x634   :  { %444 = vst [vmem:[#allocation2] sm:$0xff] %v443_v50 }
 0x635   :  { %695 = shalt.err (!%p692_p4)
}
 0x636   :  { %454 = dma.vmem_to_hbm [thread:$0]  %s452_s20, 128, %s1055_s9, [#allocation3]  }
 0x637   :  { %704 = dma.done.wait [#allocation3], 128  }
 0x638   :  { %705 = vsyncadd [#allocation3], 4294967168 }
 0x639   :  { %458 = vsyncpa [#allocation3], 1 }

</bundles_post_ra>
